<compile_context>
chip_gen: v6e
topology: v6e:2x2x1
jax: 0.10.0
libtpu: 0.0.40
codegen_flags: <defaults>
</compile_context>

<pallas_src>
import math

import jax
import jax.numpy as jnp
from jax.experimental import pallas as pl
from jax.experimental.pallas import tpu as pltpu

_LANE = 128                        # minor-most (lane) tiling unit
_SUBLANE = 8                       # second-minor (sublane) tiling unit
_MAX_TILE = 512                    # preferred upper bound per tiled dim
_BLOCK_BUDGET = 2 * 1024 * 1024    # bytes per operand block (x2 operands, x2 buffers)
_VMEM_LIMIT = 32 * 1024 * 1024     # > v5e default (16 MiB), safe on v7x (64 MiB physical)


def _choose_block(extent, unit, cap=_MAX_TILE):
    """Block size for one dim.  unit == 1 -> untiled grid dim (block 1);
    otherwise a multiple of `unit` (preferring an exact divisor) or full extent."""
    if unit == 1:
        return 1
    if extent <= unit or extent % unit != 0:
        return extent                           # full extent is always legal
    b = min(extent, cap)
    b -= b % unit
    while extent % b != 0 and b > unit:         # avoid ragged edge blocks when possible
        b -= unit
    return max(b, unit)


def _shrink_to_budget(blocks, units, itemsize, budget=_BLOCK_BUDGET):
    """Halve the largest tileable block until one block fits the VMEM budget."""
    blocks = list(blocks)
    while math.prod(blocks) * itemsize > budget:
        cand = [d for d, (b, u) in enumerate(zip(blocks, units)) if u > 1 and b >= 2 * u]
        if not cand:
            break                               # irreducible minimum (a few MiB at most)
        d = max(cand, key=lambda i: blocks[i])
        blocks[d] = max(units[d], (blocks[d] // 2) // units[d] * units[d])
    return blocks


def _grow_leading(blocks, in_shape, perm, itemsize, allow_moved):
    """Grow blocks over leading (non-minor) dims until each grid step moves
    ~_BLOCK_BUDGET bytes.  Fixed-point dims first (keeps the tile body a pure
    copy / 2-D swap); permuted dims only when allow_moved (minor-two dims are
    untouched in-tile, so the body becomes a cheap whole-vreg transpose)."""
    blocks = list(blocks)
    ndim = len(blocks)
    target = max(1, _BLOCK_BUDGET // itemsize)

    passes = [[d for d in range(ndim - 3, -1, -1) if perm[d] == d]]
    if allow_moved:
        passes.append([d for d in range(ndim - 3, -1, -1) if perm[d] != d])

    for dims in passes:
        for d in dims:
            if math.prod(blocks) >= target:
                return blocks
            rest = max(1, math.prod(blocks) // blocks[d])
            blocks[d] = max(blocks[d],
                            min(in_shape[d], max(1, target // rest)))
    return blocks


def _merge_adjacent_runs(in_shape, perm):
    """Collapse runs of input dims that stay adjacent & in order in the output.
    The merge/split reshapes around the kernel are metadata-only."""
    groups_out = []                              # groups in output order
    for j, p in enumerate(perm):
        if j > 0 and p == perm[j - 1] + 1:
            groups_out[-1].append(p)
        else:
            groups_out.append([p])
    groups_in = sorted(groups_out, key=lambda g: g[0])
    new_shape = tuple(math.prod([in_shape[d] for d in g]) for g in groups_in)
    index_of = {tuple(g): k for k, g in enumerate(groups_in)}
    new_perm = tuple(index_of[tuple(g)] for g in groups_out)
    return new_shape, new_perm


def _transpose_pallas(x, perm, minor):
    """y = jnp.transpose(x, perm), data movement done by a Pallas TPU kernel.
    `minor` describes what perm does to the minor two dims:
    "fixed" (both stay), "swap" (exchanged), "general" (anything else)."""
    ndim = x.ndim
    in_shape = x.shape
    out_shape = tuple(in_shape[p] for p in perm)
    inv = [0] * ndim
    for j, p in enumerate(perm):
        inv[p] = j

    # (8,128) constraints: a dim needs aligned blocks if it is minor in the
    # input (DMA source layout) or becomes minor in the output (DMA dest layout).
    units = [1] * ndim

    def bump(d, u):
        units[d] = units[d] * u // math.gcd(units[d], u)

    bump(ndim - 1, _LANE)
    bump(ndim - 2, _SUBLANE)
    bump(perm[-1], _LANE)
    bump(perm[-2], _SUBLANE)

    blk_in = [_choose_block(in_shape[d], units[d]) for d in range(ndim)]
    blk_in = _shrink_to_budget(blk_in, units, x.dtype.itemsize)
    # Grow leading blocks so each grid step moves enough bytes to hide the
    # per-step pipeline overhead.  When the minor-two dims stay in place we may
    # also grow permuted leading dims (in-tile fixup is whole-vreg moves only).
    blk_in = _grow_leading(blk_in, in_shape, perm, x.dtype.itemsize,
                           allow_moved=(minor == "fixed"))
    blk_in = tuple(blk_in)
    blk_out = tuple(blk_in[p] for p in perm)

    grid = tuple(pl.cdiv(out_shape[j], blk_out[j]) for j in range(ndim))

    def in_index(*idx):
        return tuple(idx[inv[d]] for d in range(ndim))

    def out_index(*idx):
        return idx

    moved_blocked = any(blk_in[d] > 1 and inv[d] != d for d in range(ndim - 2))

    if minor == "fixed" and not moved_blocked:
        def kernel(x_ref, o_ref):                 # pure DMA-driven reorder
            o_ref[...] = x_ref[...]
    elif minor == "swap" and not moved_blocked:
        def kernel(x_ref, o_ref):                 # canonical minor-two transpose (XLU)
            o_ref[...] = jnp.swapaxes(x_ref[...], -1, -2)
    else:
        def kernel(x_ref, o_ref):                 # tile-local transpose; when minor dims
            o_ref[...] = jnp.transpose(x_ref[...], perm)   # are fixed this is vreg moves only

    nbytes = x.size * x.dtype.itemsize
    return pl.pallas_call(
        kernel,
        out_shape=jax.ShapeDtypeStruct(out_shape, x.dtype),
        grid=grid,
        in_specs=[pl.BlockSpec(blk_in, in_index)],
        out_specs=pl.BlockSpec(blk_out, out_index),
        compiler_params=pltpu.CompilerParams(
            dimension_semantics=("parallel",) * ndim,
            vmem_limit_bytes=_VMEM_LIMIT,
        ),
        cost_estimate=pl.CostEstimate(
            flops=0, transcendentals=0, bytes_accessed=2 * nbytes),
    )(x)


def dimshuffle_pallas(x, pattern):
    """Equivalent of DimShuffle(pattern).forward(x)."""
    pattern = tuple(pattern)
    perm = tuple(int(p) for p in pattern if p != 'x')
    assert sorted(perm) == list(range(x.ndim)), \
        "pattern must reference every input dim exactly once"

    if perm == tuple(range(x.ndim)):
        y = x                                           # identity: metadata only, no kernel
    elif x.ndim >= 2 and perm[-2:] == (x.ndim - 2, x.ndim - 1):
        # Minor two dims stay put: DMA-driven reorder / leading-dim vreg transpose.
        y = _transpose_pallas(x, perm, minor="fixed")
    else:
        # Collapse dims that travel together (free reshapes), then transpose.
        new_shape, new_perm = _merge_adjacent_runs(x.shape, perm)
        out_shape = tuple(x.shape[p] for p in perm)
        xc = x.reshape(new_shape)
        nd = len(new_perm)
        if nd == 1:
            y = xc
        else:
            minor = "swap" if new_perm[-2:] == (nd - 1, nd - 2) else "general"
            y = _transpose_pallas(xc, new_perm, minor=minor)
        y = y.reshape(out_shape)
    # TODO(synk): when the permuted output's minor dim is tiny (e.g. NHWC with C=4)
    # stores stay lane-narrow; widening them needs an in-kernel sublane->lane
    # reshape, which is skipped here for lowering robustness.

    final_shape = list(y.shape)
    for idx, e in enumerate(pattern):
        if e == 'x':
            final_shape.insert(idx, 1)
    return y.reshape(final_shape)


if __name__ == "__main__":
    key = jax.random.PRNGKey(0)
    x = jax.random.normal(key, (2, 4, 16, 16), dtype=jnp.float32)   # NCHW

    # The module under test: DimShuffle(pattern=(0, 'x', 2, 3, 1)): NCHW -> N,1,H,W,C
    pattern = (0, 'x', 2, 3, 1)
    out = jax.block_until_ready(dimshuffle_pallas(x, pattern))
    ref = jnp.transpose(x, (0, 2, 3, 1)).reshape(2, 1, 16, 16, 4)
    assert out.shape == ref.shape and out.dtype == ref.dtype
    assert jnp.array_equal(out, ref), "dimshuffle mismatch vs reference"

    # Extra patterns exercising the other code paths.
    extra = [
        (1, 0, 2, 3),          # leading-dim permute: grown-block leading transpose
        (0, 1, 3, 2),          # minor-dim swap path
        ('x', 0, 1, 2, 3),     # identity + broadcast dim: no kernel
    ]
    for pat in extra:
        got = jax.block_until_ready(dimshuffle_pallas(x, pat))
        p = tuple(d for d in pat if d != 'x')
        want = jnp.transpose(x, p)
        shp = list(want.shape)
        for i, e in enumerate(pat):
            if e == 'x':
                shp.insert(i, 1)
        want = want.reshape(shp)
        assert got.shape == want.shape and jnp.array_equal(got, want), pat

    # Larger minor plane: leading permute keeps minor (8,128) layout untouched,
    # exercises the grown-block / whole-vreg-transpose body in a single grid step.
    x3 = jax.random.normal(jax.random.PRNGKey(0), (16, 8, 8, 128), dtype=jnp.float32)
    got3 = jax.block_until_ready(dimshuffle_pallas(x3, (1, 0, 2, 3)))
    assert jnp.array_equal(got3, jnp.transpose(x3, (1, 0, 2, 3)))

    # Classic 2-D transpose.
    x2 = jax.random.normal(jax.random.PRNGKey(0), (16, 256), dtype=jnp.float32)
    got2 = jax.block_until_ready(dimshuffle_pallas(x2, (1, 0)))
    assert jnp.array_equal(got2, x2.T)

    print("KERNEL_OK")
</pallas_src>

<mosaic_0001>
module attributes {stable_mosaic.version = 11 : i64} {
  func.func @kernel(%arg0: i32, %arg1: i32, %arg2: i32, %arg3: memref<2x4x256xf32, #tpu.memory_space<vmem>>, %arg4: memref<2x256x4xf32, #tpu.memory_space<vmem>>) attributes {dimension_semantics = [#tpu.dimension_semantics<parallel>, #tpu.dimension_semantics<parallel>, #tpu.dimension_semantics<parallel>], iteration_bounds = array<i64: 1, 1, 1>, scalar_prefetch = 0 : i64, scratch_operands = 0 : i64, tpu.core_type = #tpu.core_type<tc>, window_params = [{transform_indices = @transform_0, window_bounds = array<i64: 2, 4, 256>}, {transform_indices = @transform_1, window_bounds = array<i64: 2, 256, 4>}]} {
    %c0 = arith.constant 0 : index
    %c0_0 = arith.constant 0 : index
    %c0_1 = arith.constant 0 : index
    %0 = vector.load %arg3[%c0, %c0_0, %c0_1] : memref<2x4x256xf32, #tpu.memory_space<vmem>>, vector<2x4x256xf32>
    %1 = tpu.transpose %0, [0, 2, 1] : vector<2x4x256xf32> -> vector<2x256x4xf32>
    %c0_2 = arith.constant 0 : index
    %c0_3 = arith.constant 0 : index
    %c0_4 = arith.constant 0 : index
    %2 = vector.load %arg4[%c0_2, %c0_3, %c0_4] : memref<2x256x4xf32, #tpu.memory_space<vmem>>, vector<2x256x4xf32>
    tpu.vector_store %arg4[%c0_2, %c0_3, %c0_4], %1 {strides = array<i32>} : memref<2x256x4xf32, #tpu.memory_space<vmem>>, vector<2x256x4xf32>,
    return
  }
  func.func @transform_0(%arg0: i32, %arg1: i32, %arg2: i32) -> (i32, i32, i32) {
    %c0_i32 = arith.constant 0 : i32
    return %arg0, %arg2, %arg1 : i32, i32, i32
  }
  func.func @transform_1(%arg0: i32, %arg1: i32, %arg2: i32) -> (i32, i32, i32) {
    %c0_i32 = arith.constant 0 : i32
    return %arg0, %arg1, %arg2 : i32, i32, i32
  }
}

</mosaic_0001>

<bundles_post_ra>
// kernel: tpu_custom_call.1
= control target key start
LH: loop header
LB: loop body
LE: loop exit
PB: predicated region body
PF: predicated region fallthrough
CT: control target
= control target key end

     0   :  { %6 = vsyncpa [#allocation3], 0  ;;  %s256_s6 = smov [#allocation2]   ;;  %s528_s0 = inlined_call_operand.hbm [shape: f32[2,4,256], index: 0, kind: input, shape index: {}]   ;;  %s529_s1 = inlined_call_operand.vmem [shape: f32[2,256,4], index: 1, kind: output, shape index: {}]  }
   0x1   :  { %s12_s7 = sshll.u32 %s256_s6, 4  ;;  %s13_s7 = int_to_ptr.vmem [resolvable:$true] %s12_s7 }
   0x2   :  { %s242_s8 = scalar_lea.vmem %s13_s7, 256  ;;  %p247_p1 = scmp.lt.s32.totalorder %s13_s7, %s13_s7 }
   0x3   :  { %p243_p0 = scmp.ne.s32.totalorder %s13_s7, %s242_s8  ;;  %p248_p2 = scmp.lt.s32.totalorder %s242_s8, %s242_s8 }
   0x5   :  { %p249_p3 = por %p248_p2, %p247_p1 }
   0x7   :  { %p250_p4 = pnand %p249_p3, %p243_p0 }
   0x9   :  { %253 = shalt.err (!%p250_p4)
}
   0xa   :  { %s257_s9 = smov 128   ;;  %s258_s10 = smov 8  }
   0xb   :  { %18 = dma.hbm_to_vmem [thread:$0]  %s528_s0, 256, %s13_s7, [#allocation3], %s257_s9, %s257_s9, %s258_s10  }
   0xc   :  { %254 = dma.done.wait [#allocation3], 256  }
   0xd   :  { %255 = vsyncadd [#allocation3], 4294967040  ;;  %v23_v0 = vld [vmem:[#allocation2 + $0x8] sm:$0xff]  ;;  %v22_v1 = vld [vmem:[#allocation2] sm:$0xff]  ;;  %vm158_vm0 = vcmask 31744  }
   0xe   :  { %94 = vxpose.xlu1.b32.start.end [1/1] (short) %v23_v0, 128  ;;  %30 = vxpose.xlu0.b32.start.end [1/1] (short) %v22_v1, 128  ;;  %v27_v2 = vcombine.high %v23_v0, %v23_v0  ;;  %v26_v3 = vcombine.high %v22_v1, %v22_v1 }
  0x4b   :  { %126 = vxpose.xlu1.b32.start.end [1/1] (short) %v27_v2, 128  ;;  %62 = vxpose.xlu0.b32.start.end [1/1] (short) %v26_v3, 128 }
  0x8a   :  { %v110_v4 = vpop.trf.xlu1  ;;  %v46_v5 = vpop.trf.xlu0 }
  0x8b   :  { %191 = vst.msk [vmem:[%s529_s1 + $0x100] sm:$0xff] %vm158_vm0, %v110_v4  ;;  %159 = vst.msk [vmem:[%s529_s1] sm:$0xff] %vm158_vm0, %v46_v5 }
  0x8e   :  { %v111_v6 = vpop.trf.xlu1  ;;  %v47_v7 = vpop.trf.xlu0 }
  0x8f   :  { %192 = vst.msk [vmem:[%s529_s1 + $0x108] sm:$0xff] %vm158_vm0, %v111_v6  ;;  %160 = vst.msk [vmem:[%s529_s1 + $0x8] sm:$0xff] %vm158_vm0, %v47_v7 }
  0x92   :  { %v112_v8 = vpop.trf.xlu1  ;;  %v48_v9 = vpop.trf.xlu0 }
  0x93   :  { %193 = vst.msk [vmem:[%s529_s1 + $0x110] sm:$0xff] %vm158_vm0, %v112_v8  ;;  %161 = vst.msk [vmem:[%s529_s1 + $0x10] sm:$0xff] %vm158_vm0, %v48_v9 }
  0x96   :  { %v113_v10 = vpop.trf.xlu1  ;;  %v49_v11 = vpop.trf.xlu0 }
  0x97   :  { %194 = vst.msk [vmem:[%s529_s1 + $0x118] sm:$0xff] %vm158_vm0, %v113_v10  ;;  %162 = vst.msk [vmem:[%s529_s1 + $0x18] sm:$0xff] %vm158_vm0, %v49_v11 }
  0x9a   :  { %v114_v12 = vpop.trf.xlu1  ;;  %v50_v13 = vpop.trf.xlu0 }
  0x9b   :  { %195 = vst.msk [vmem:[%s529_s1 + $0x120] sm:$0xff] %vm158_vm0, %v114_v12  ;;  %163 = vst.msk [vmem:[%s529_s1 + $0x20] sm:$0xff] %vm158_vm0, %v50_v13 }
  0x9e   :  { %v115_v14 = vpop.trf.xlu1  ;;  %v51_v15 = vpop.trf.xlu0 }
  0x9f   :  { %196 = vst.msk [vmem:[%s529_s1 + $0x128] sm:$0xff] %vm158_vm0, %v115_v14  ;;  %164 = vst.msk [vmem:[%s529_s1 + $0x28] sm:$0xff] %vm158_vm0, %v51_v15 }
  0xa2   :  { %v116_v16 = vpop.trf.xlu1  ;;  %v52_v17 = vpop.trf.xlu0 }
  0xa3   :  { %197 = vst.msk [vmem:[%s529_s1 + $0x130] sm:$0xff] %vm158_vm0, %v116_v16  ;;  %165 = vst.msk [vmem:[%s529_s1 + $0x30] sm:$0xff] %vm158_vm0, %v52_v17 }
  0xa6   :  { %v117_v18 = vpop.trf.xlu1  ;;  %v53_v19 = vpop.trf.xlu0 }
  0xa7   :  { %198 = vst.msk [vmem:[%s529_s1 + $0x138] sm:$0xff] %vm158_vm0, %v117_v18  ;;  %166 = vst.msk [vmem:[%s529_s1 + $0x38] sm:$0xff] %vm158_vm0, %v53_v19 }
  0xaa   :  { %v118_v20 = vpop.trf.xlu1  ;;  %v54_v21 = vpop.trf.xlu0 }
  0xab   :  { %199 = vst.msk [vmem:[%s529_s1 + $0x140] sm:$0xff] %vm158_vm0, %v118_v20  ;;  %167 = vst.msk [vmem:[%s529_s1 + $0x40] sm:$0xff] %vm158_vm0, %v54_v21 }
  0xae   :  { %v119_v22 = vpop.trf.xlu1  ;;  %v55_v23 = vpop.trf.xlu0 }
  0xaf   :  { %200 = vst.msk [vmem:[%s529_s1 + $0x148] sm:$0xff] %vm158_vm0, %v119_v22  ;;  %168 = vst.msk [vmem:[%s529_s1 + $0x48] sm:$0xff] %vm158_vm0, %v55_v23 }
  0xb2   :  { %v120_v24 = vpop.trf.xlu1  ;;  %v56_v25 = vpop.trf.xlu0 }
  0xb3   :  { %201 = vst.msk [vmem:[%s529_s1 + $0x150] sm:$0xff] %vm158_vm0, %v120_v24  ;;  %169 = vst.msk [vmem:[%s529_s1 + $0x50] sm:$0xff] %vm158_vm0, %v56_v25 }
  0xb6   :  { %v121_v26 = vpop.trf.xlu1  ;;  %v57_v27 = vpop.trf.xlu0 }
  0xb7   :  { %202 = vst.msk [vmem:[%s529_s1 + $0x158] sm:$0xff] %vm158_vm0, %v121_v26  ;;  %170 = vst.msk [vmem:[%s529_s1 + $0x58] sm:$0xff] %vm158_vm0, %v57_v27 }
  0xba   :  { %v122_v28 = vpop.trf.xlu1  ;;  %v58_v29 = vpop.trf.xlu0 }
  0xbb   :  { %203 = vst.msk [vmem:[%s529_s1 + $0x160] sm:$0xff] %vm158_vm0, %v122_v28  ;;  %171 = vst.msk [vmem:[%s529_s1 + $0x60] sm:$0xff] %vm158_vm0, %v58_v29 }
  0xbe   :  { %v123_v30 = vpop.trf.xlu1  ;;  %v59_v31 = vpop.trf.xlu0 }
  0xbf   :  { %204 = vst.msk [vmem:[%s529_s1 + $0x168] sm:$0xff] %vm158_vm0, %v123_v30  ;;  %172 = vst.msk [vmem:[%s529_s1 + $0x68] sm:$0xff] %vm158_vm0, %v59_v31 }
  0xc2   :  { %v124_v32 = vpop.trf.xlu1  ;;  %v60_v33 = vpop.trf.xlu0 }
  0xc3   :  { %205 = vst.msk [vmem:[%s529_s1 + $0x170] sm:$0xff] %vm158_vm0, %v124_v32  ;;  %173 = vst.msk [vmem:[%s529_s1 + $0x70] sm:$0xff] %vm158_vm0, %v60_v33 }
  0xc6   :  { %v125_v34 = vpop.trf.xlu1  ;;  %v61_v35 = vpop.trf.xlu0 }
  0xc7   :  { %206 = vst.msk [vmem:[%s529_s1 + $0x178] sm:$0xff] %vm158_vm0, %v125_v34  ;;  %174 = vst.msk [vmem:[%s529_s1 + $0x78] sm:$0xff] %vm158_vm0, %v61_v35 }
  0xca   :  { %v142_v36 = vpop.trf.xlu1  ;;  %v78_v37 = vpop.trf.xlu0 }
  0xcb   :  { %207 = vst.msk [vmem:[%s529_s1 + $0x180] sm:$0xff] %vm158_vm0, %v142_v36  ;;  %175 = vst.msk [vmem:[%s529_s1 + $0x80] sm:$0xff] %vm158_vm0, %v78_v37 }
  0xce   :  { %v143_v38 = vpop.trf.xlu1  ;;  %v79_v39 = vpop.trf.xlu0 }
  0xcf   :  { %208 = vst.msk [vmem:[%s529_s1 + $0x188] sm:$0xff] %vm158_vm0, %v143_v38  ;;  %176 = vst.msk [vmem:[%s529_s1 + $0x88] sm:$0xff] %vm158_vm0, %v79_v39 }
  0xd2   :  { %v144_v40 = vpop.trf.xlu1  ;;  %v80_v41 = vpop.trf.xlu0 }
  0xd3   :  { %209 = vst.msk [vmem:[%s529_s1 + $0x190] sm:$0xff] %vm158_vm0, %v144_v40  ;;  %177 = vst.msk [vmem:[%s529_s1 + $0x90] sm:$0xff] %vm158_vm0, %v80_v41 }
  0xd6   :  { %v145_v42 = vpop.trf.xlu1  ;;  %v81_v43 = vpop.trf.xlu0 }
  0xd7   :  { %210 = vst.msk [vmem:[%s529_s1 + $0x198] sm:$0xff] %vm158_vm0, %v145_v42  ;;  %178 = vst.msk [vmem:[%s529_s1 + $0x98] sm:$0xff] %vm158_vm0, %v81_v43 }
  0xda   :  { %v146_v44 = vpop.trf.xlu1  ;;  %v82_v45 = vpop.trf.xlu0 }
  0xdb   :  { %211 = vst.msk [vmem:[%s529_s1 + $0x1a0] sm:$0xff] %vm158_vm0, %v146_v44  ;;  %179 = vst.msk [vmem:[%s529_s1 + $0xa0] sm:$0xff] %vm158_vm0, %v82_v45 }
  0xde   :  { %v147_v46 = vpop.trf.xlu1  ;;  %v83_v47 = vpop.trf.xlu0 }
  0xdf   :  { %212 = vst.msk [vmem:[%s529_s1 + $0x1a8] sm:$0xff] %vm158_vm0, %v147_v46  ;;  %180 = vst.msk [vmem:[%s529_s1 + $0xa8] sm:$0xff] %vm158_vm0, %v83_v47 }
  0xe2   :  { %v148_v48 = vpop.trf.xlu1  ;;  %v84_v49 = vpop.trf.xlu0 }
  0xe3   :  { %213 = vst.msk [vmem:[%s529_s1 + $0x1b0] sm:$0xff] %vm158_vm0, %v148_v48  ;;  %181 = vst.msk [vmem:[%s529_s1 + $0xb0] sm:$0xff] %vm158_vm0, %v84_v49 }
  0xe6   :  { %v149_v50 = vpop.trf.xlu1  ;;  %v85_v51 = vpop.trf.xlu0 }
  0xe7   :  { %214 = vst.msk [vmem:[%s529_s1 + $0x1b8] sm:$0xff] %vm158_vm0, %v149_v50  ;;  %182 = vst.msk [vmem:[%s529_s1 + $0xb8] sm:$0xff] %vm158_vm0, %v85_v51 }
  0xea   :  { %v150_v52 = vpop.trf.xlu1  ;;  %v86_v53 = vpop.trf.xlu0 }
  0xeb   :  { %215 = vst.msk [vmem:[%s529_s1 + $0x1c0] sm:$0xff] %vm158_vm0, %v150_v52  ;;  %183 = vst.msk [vmem:[%s529_s1 + $0xc0] sm:$0xff] %vm158_vm0, %v86_v53 }
  0xee   :  { %v151_v54 = vpop.trf.xlu1  ;;  %v87_v55 = vpop.trf.xlu0 }
  0xef   :  { %216 = vst.msk [vmem:[%s529_s1 + $0x1c8] sm:$0xff] %vm158_vm0, %v151_v54  ;;  %184 = vst.msk [vmem:[%s529_s1 + $0xc8] sm:$0xff] %vm158_vm0, %v87_v55 }
  0xf2   :  { %v152_v56 = vpop.trf.xlu1  ;;  %v88_v57 = vpop.trf.xlu0 }
  0xf3   :  { %217 = vst.msk [vmem:[%s529_s1 + $0x1d0] sm:$0xff] %vm158_vm0, %v152_v56  ;;  %185 = vst.msk [vmem:[%s529_s1 + $0xd0] sm:$0xff] %vm158_vm0, %v88_v57 }
  0xf6   :  { %v153_v58 = vpop.trf.xlu1  ;;  %v89_v59 = vpop.trf.xlu0 }
  0xf7   :  { %218 = vst.msk [vmem:[%s529_s1 + $0x1d8] sm:$0xff] %vm158_vm0, %v153_v58  ;;  %186 = vst.msk [vmem:[%s529_s1 + $0xd8] sm:$0xff] %vm158_vm0, %v89_v59 }
  0xfa   :  { %v154_v60 = vpop.trf.xlu1  ;;  %v90_v61 = vpop.trf.xlu0 }
  0xfb   :  { %219 = vst.msk [vmem:[%s529_s1 + $0x1e0] sm:$0xff] %vm158_vm0, %v154_v60  ;;  %187 = vst.msk [vmem:[%s529_s1 + $0xe0] sm:$0xff] %vm158_vm0, %v90_v61 }
  0xfe   :  { %v155_v62 = vpop.trf.xlu1  ;;  %v91_v63 = vpop.trf.xlu0 }
  0xff   :  { %220 = vst.msk [vmem:[%s529_s1 + $0x1e8] sm:$0xff] %vm158_vm0, %v155_v62  ;;  %188 = vst.msk [vmem:[%s529_s1 + $0xe8] sm:$0xff] %vm158_vm0, %v91_v63 }
 0x102   :  { %v156_v0 = vpop.trf.xlu1  ;;  %v92_v1 = vpop.trf.xlu0 }
 0x103   :  { %221 = vst.msk [vmem:[%s529_s1 + $0x1f0] sm:$0xff] %vm158_vm0, %v156_v0  ;;  %189 = vst.msk [vmem:[%s529_s1 + $0xf0] sm:$0xff] %vm158_vm0, %v92_v1 }
 0x106   :  { %v157_v2 = vpop.trf.xlu1  ;;  %v93_v3 = vpop.trf.xlu0 }
 0x107   :  { %222 = vst.msk [vmem:[%s529_s1 + $0x1f8] sm:$0xff] %vm158_vm0, %v157_v2  ;;  %190 = vst.msk [vmem:[%s529_s1 + $0xf8] sm:$0xff] %vm158_vm0, %v93_v3 }
 0x108   :  { %227 = vsyncpa [#allocation3], 1 }

</bundles_post_ra>
